<compile_context>
chip_gen: v5e
topology: v5e:2x2
jax: 0.10.0
libtpu: 0.0.40
codegen_flags: <defaults>
</compile_context>

<pallas_src>
import functools
import math

import jax
import jax.numpy as jnp
from jax.experimental import pallas as pl
from jax.experimental.pallas import tpu as pltpu


# ----------------------------- Pallas kernel ------------------------------ #
def _conv1d_glu_kernel(x_ref, w_ref, b_ref, o_ref, *, out_channels,
                       kernel_size, pad, t_out, batch_block):
    """One grid step: `batch_block` batch elements, whole (lane-padded) T.

    x_ref : (bb, C, t_out + 2*pad)   pre-padded activation (halo + lane pad)
    w_ref : (2*Co, K*C)              tap-stacked conv weight
    b_ref : (2*Co, 1)                conv bias
    o_ref : (bb, Co, t_out)          residual + GLU(conv(x))
    """
    centers = []
    cols = []
    for bi in range(batch_block):                       # static unroll
        xb = x_ref[bi]                                   # (C, t_out + 2*pad)
        taps = [xb[:, k:k + t_out] for k in range(kernel_size)]
        centers.append(taps[pad])                        # residual (no re-read)
        cols.append(jnp.concatenate(taps, axis=0))       # (K*C, t_out) im2col

    # Fold batch elements into the lane axis -> ONE deep, fat MXU matmul:
    # (2*Co, K*C) @ (K*C, bb*t_out); contraction depth K*C, lane-dense N.
    stacked = jnp.concatenate(cols, axis=1)              # (K*C, bb*t_out)
    acc = jnp.dot(w_ref[...], stacked, preferred_element_type=jnp.float32)
    acc = acc + b_ref[...].astype(jnp.float32)           # broadcast over lanes

    # Fused GLU epilogue (f32).  approx=True would push the reciprocal onto
    # the EUP; kept exact here so the f32 correctness check stays tight.
    x1 = acc[:out_channels, :]
    x2 = acc[out_channels:, :]
    gated = x1 * pl.reciprocal(1.0 + jnp.exp(-x2), approx=False)

    for bi in range(batch_block):
        lo = bi * t_out
        res = centers[bi].astype(jnp.float32)
        o_ref[bi] = (res + gated[:, lo:lo + t_out]).astype(o_ref.dtype)


# ------------------------------ Forward glue ------------------------------ #
def conv1d_glu_forward(x, weight, bias):
    """Conv1dGLU.forward (eval mode): x + GLU(Conv1d(x)).

    x      : (B, C, T)
    weight : (2*C, C, K)   PyTorch Conv1d weight layout (O, I, K)
    bias   : (2*C,)
    """
    b_dim, c, t = x.shape
    two_co, c_in, k_size = weight.shape
    assert c_in == c and two_co % 2 == 0
    co = two_co // 2
    assert co == c, "residual connection requires in_channels == out_channels"
    assert k_size % 2 == 1, "ConvNorm default padding needs odd kernel_size"
    assert x.dtype == weight.dtype == bias.dtype
    pad = (k_size - 1) // 2
    itemsize = jnp.dtype(x.dtype).itemsize

    # Lane-dense output: pad T up to a multiple of 128 once in HBM.  The same
    # one-time pad bakes in the conv "same" halo, so the kernel needs no VMEM
    # halo scratch and no per-step zero stores.
    t_out = ((t + 127) // 128) * 128
    x_halo = jnp.pad(x, ((0, 0), (0, 0), (pad, pad + (t_out - t))))

    # One-time parameter reshapes (tap-major, matches the in-kernel im2col).
    w2d = jnp.transpose(weight, (0, 2, 1)).reshape(two_co, k_size * c)
    bias2d = bias.reshape(two_co, 1)

    # ---- batch block: fat steps, bounded VMEM, >=2 parallel steps --------- #
    def footprint(bb):
        in_blk = bb * c * (t_out + 2 * pad) * itemsize
        out_blk = bb * co * t_out * itemsize
        w_bytes = two_co * k_size * c * itemsize + two_co * itemsize
        pipeline = 2 * (in_blk + out_blk) + 2 * w_bytes      # double-buffered
        work = 4 * bb * t_out * (k_size * c + 2 * two_co)    # f32 im2col + acc
        return pipeline + work

    budget = 40 * 1024 * 1024        # headroom under v7x's 64 MiB/TC VMEM
    divisors = [d for d in range(1, min(b_dim, 8) + 1) if b_dim % d == 0]
    fitting = [d for d in divisors if footprint(d) <= budget] or [1]
    bb = max(fitting)
    if b_dim // bb < 2:              # expose >=2 grid steps for v7x megacore
        alt = [d for d in fitting if b_dim // d >= 2]
        if alt:
            bb = max(alt)
    n_steps = b_dim // bb

    # TODO(synk): for very long T where even bb=1 exceeds ~64 MiB (v7x), tile
    # the time axis with a manual halo DMA instead of whole-T blocks.
    vmem_limit = int(min(100 * 1024 * 1024,
                         max(32 * 1024 * 1024,
                             footprint(bb) + 4 * 1024 * 1024)))

    kernel = functools.partial(_conv1d_glu_kernel, out_channels=co,
                               kernel_size=k_size, pad=pad, t_out=t_out,
                               batch_block=bb)

    cost = pl.CostEstimate(
        flops=2 * b_dim * two_co * k_size * c * t,
        transcendentals=b_dim * co * t,
        bytes_accessed=(x.size + weight.size + bias.size + b_dim * co * t)
                       * itemsize,
    )

    # TODO(synk): nn.Dropout training-mode masking (pltpu.prng_*) not
    # implemented; this is the deterministic eval/inference forward.
    out = pl.pallas_call(
        kernel,
        out_shape=jax.ShapeDtypeStruct((b_dim, co, t_out), x.dtype),
        grid_spec=pltpu.PrefetchScalarGridSpec(
            num_scalar_prefetch=0,
            grid=(n_steps,),
            in_specs=[
                pl.BlockSpec((bb, c, t_out + 2 * pad), lambda i: (i, 0, 0)),
                pl.BlockSpec((two_co, k_size * c), lambda i: (0, 0)),
                pl.BlockSpec((two_co, 1), lambda i: (0, 0)),
            ],
            out_specs=pl.BlockSpec((bb, co, t_out), lambda i: (i, 0, 0)),
        ),
        compiler_params=pltpu.CompilerParams(
            dimension_semantics=("parallel",),
            vmem_limit_bytes=vmem_limit,
        ),
        cost_estimate=cost,
    )(x_halo, w2d, bias2d)

    return out[:, :, :t]


# ---------------------------------- main ----------------------------------- #
if __name__ == "__main__":
    key = jax.random.PRNGKey(0)
    k_x, k_w, k_b = jax.random.split(key, 3)

    batch, channels, t_len = 2, 32, 64
    kernel_size = 5                  # Conv1dGLU(in=32, out=32, k=5, p=0.1)

    x = jax.random.normal(k_x, (batch, channels, t_len), dtype=jnp.float32)

    # PyTorch Conv1d default init: U(-1/sqrt(fan_in), 1/sqrt(fan_in))
    fan_in = channels * kernel_size
    bound = 1.0 / math.sqrt(fan_in)
    weight = jax.random.uniform(k_w, (2 * channels, channels, kernel_size),
                                minval=-bound, maxval=bound, dtype=jnp.float32)
    bias = jax.random.uniform(k_b, (2 * channels,),
                              minval=-bound, maxval=bound, dtype=jnp.float32)

    y = jax.block_until_ready(conv1d_glu_forward(x, weight, bias))

    # Pure-JAX reference for the full Conv1dGLU forward (eval mode).
    pad = (kernel_size - 1) // 2
    conv = jax.lax.conv_general_dilated(
        x, weight, window_strides=(1,), padding=[(pad, pad)],
        dimension_numbers=("NCH", "OIH", "NCH"))
    conv = conv + bias[None, :, None]
    x1, x2 = conv[:, :channels, :], conv[:, channels:, :]
    y_ref = x + x1 * jax.nn.sigmoid(x2)

    assert y.shape == (batch, channels, t_len)
    assert jnp.allclose(y, y_ref, atol=1e-4, rtol=1e-4), float(
        jnp.max(jnp.abs(y - y_ref)))
    print("KERNEL_OK")
</pallas_src>

<mosaic_0001>
module attributes {stable_mosaic.version = 11 : i64} {
  func.func @_conv1d_glu_kernel(%arg0: i32, %arg1: memref<1x32x132xf32, #tpu.memory_space<vmem>>, %arg2: memref<64x160xf32, #tpu.memory_space<vmem>>, %arg3: memref<64x1xf32, #tpu.memory_space<vmem>>, %arg4: memref<1x32x128xf32, #tpu.memory_space<vmem>>) attributes {dimension_semantics = [#tpu.dimension_semantics<parallel>], iteration_bounds = array<i64: 2>, scalar_prefetch = 0 : i64, scratch_operands = 0 : i64, tpu.core_type = #tpu.core_type<tc>, window_params = [{transform_indices = @transform_0, window_bounds = array<i64: 1, 32, 132>}, {pipeline_mode = #tpu.pipeline_mode<synchronous>, transform_indices = @transform_1, window_bounds = array<i64: 64, 160>}, {pipeline_mode = #tpu.pipeline_mode<synchronous>, transform_indices = @transform_2, window_bounds = array<i64: 64, 1>}, {transform_indices = @transform_3, window_bounds = array<i64: 1, 32, 128>}]} {
    %c0 = arith.constant 0 : index
    %c0_0 = arith.constant 0 : index
    %c0_1 = arith.constant 0 : index
    %0 = vector.load %arg1[%c0, %c0_0, %c0_1] : memref<1x32x132xf32, #tpu.memory_space<vmem>>, vector<1x32x132xf32>
    %1 = vector.shape_cast %0 : vector<1x32x132xf32> to vector<32x132xf32>
    %2 = vector.extract_strided_slice %1 {offsets = [0, 0], sizes = [32, 128], strides = [1, 1]} : vector<32x132xf32> to vector<32x128xf32>
    %3 = vector.extract_strided_slice %1 {offsets = [0, 1], sizes = [32, 128], strides = [1, 1]} : vector<32x132xf32> to vector<32x128xf32>
    %4 = vector.extract_strided_slice %1 {offsets = [0, 2], sizes = [32, 128], strides = [1, 1]} : vector<32x132xf32> to vector<32x128xf32>
    %5 = vector.extract_strided_slice %1 {offsets = [0, 3], sizes = [32, 128], strides = [1, 1]} : vector<32x132xf32> to vector<32x128xf32>
    %6 = vector.extract_strided_slice %1 {offsets = [0, 4], sizes = [32, 128], strides = [1, 1]} : vector<32x132xf32> to vector<32x128xf32>
    %7 = tpu.concatenate %2, %3, %4, %5, %6 in 0 : vector<32x128xf32>, vector<32x128xf32>, vector<32x128xf32>, vector<32x128xf32>, vector<32x128xf32> -> vector<160x128xf32>
    %c0_2 = arith.constant 0 : index
    %c0_3 = arith.constant 0 : index
    %8 = vector.load %arg2[%c0_2, %c0_3] : memref<64x160xf32, #tpu.memory_space<vmem>>, vector<64x160xf32>
    %cst = arith.constant dense<0.000000e+00> : vector<64x128xf32>
    %9 = tpu.matmul %8, %7, %cst {dimension_numbers = #tpu.dot_dimension_numbers<[1], [0], [0], [1], [0, 0, 1, 1], [], []>} : vector<64x160xf32>, vector<160x128xf32>, vector<64x128xf32> -> vector<64x128xf32>
    %c0_4 = arith.constant 0 : index
    %c0_5 = arith.constant 0 : index
    %10 = vector.load %arg3[%c0_4, %c0_5] : memref<64x1xf32, #tpu.memory_space<vmem>>, vector<64x1xf32>
    %11 = vector.broadcast %10 : vector<64x1xf32> to vector<64x128xf32>
    %12 = arith.addf %9, %11 : vector<64x128xf32>
    %13 = vector.extract_strided_slice %12 {offsets = [0, 0], sizes = [32, 128], strides = [1, 1]} : vector<64x128xf32> to vector<32x128xf32>
    %14 = vector.extract_strided_slice %12 {offsets = [32, 0], sizes = [32, 128], strides = [1, 1]} : vector<64x128xf32> to vector<32x128xf32>
    %cst_6 = arith.constant 0.000000e+00 : f32
    %15 = vector.broadcast %cst_6 : f32 to vector<32x128xf32>
    %16 = arith.subf %15, %14 : vector<32x128xf32>
    %17 = math.exp %16 : vector<32x128xf32>
    %cst_7 = arith.constant 1.000000e+00 : f32
    %18 = vector.broadcast %cst_7 : f32 to vector<32x128xf32>
    %19 = arith.addf %18, %17 : vector<32x128xf32>
    %20 = tpu.reciprocal %19 : vector<32x128xf32> -> vector<32x128xf32>
    %21 = arith.mulf %13, %20 : vector<32x128xf32>
    %22 = arith.addf %4, %21 : vector<32x128xf32>
    %c0_8 = arith.constant 0 : index
    %c0_9 = arith.constant 0 : index
    %c0_10 = arith.constant 0 : index
    %23 = vector.load %arg4[%c0_8, %c0_9, %c0_10] : memref<1x32x128xf32, #tpu.memory_space<vmem>>, vector<1x32x128xf32>
    %24 = vector.shape_cast %23 : vector<1x32x128xf32> to vector<32x128xf32>
    %25 = vector.shape_cast %22 : vector<32x128xf32> to vector<1x32x128xf32>
    tpu.vector_store %arg4[%c0_8, %c0_9, %c0_10], %25 {strides = array<i32>} : memref<1x32x128xf32, #tpu.memory_space<vmem>>, vector<1x32x128xf32>,
    return
  }
  func.func @transform_0(%arg0: i32) -> (i32, i32, i32) {
    %c0_i32 = arith.constant 0 : i32
    %c0_i32_0 = arith.constant 0 : i32
    %c0_i32_1 = arith.constant 0 : i32
    return %arg0, %c0_i32, %c0_i32_0 : i32, i32, i32
  }
  func.func @transform_1(%arg0: i32) -> (i32, i32) {
    %c0_i32 = arith.constant 0 : i32
    %c0_i32_0 = arith.constant 0 : i32
    %c0_i32_1 = arith.constant 0 : i32
    return %c0_i32, %c0_i32_0 : i32, i32
  }
  func.func @transform_2(%arg0: i32) -> (i32, i32) {
    %c0_i32 = arith.constant 0 : i32
    %c0_i32_0 = arith.constant 0 : i32
    %c0_i32_1 = arith.constant 0 : i32
    return %c0_i32, %c0_i32_0 : i32, i32
  }
  func.func @transform_3(%arg0: i32) -> (i32, i32, i32) {
    %c0_i32 = arith.constant 0 : i32
    %c0_i32_0 = arith.constant 0 : i32
    %c0_i32_1 = arith.constant 0 : i32
    return %arg0, %c0_i32, %c0_i32_0 : i32, i32, i32
  }
}

</mosaic_0001>

<bundles_post_ra>
// kernel: tpu_custom_call.1
= control target key start
LH: loop header
LB: loop body
LE: loop exit
PB: predicated region body
PF: predicated region fallthrough
CT: control target
= control target key end

     0   :  { %8 = vsyncpa [#allocation3], 0  ;;  %s1428_s0 = inlined_call_operand.hbm [shape: f32[2,32,132], index: 0, kind: input, shape index: {}]   ;;  %s1429_s1 = inlined_call_operand.hbm [shape: f32[64,160], index: 1, kind: input, shape index: {}]   ;;  %s1430_s2 = inlined_call_operand.vmem [shape: f32[64,1], index: 2, kind: input, shape index: {}]   ;;  %s1431_s3 = inlined_call_operand.hbm [shape: f32[2,32,128], index: 3, kind: output, shape index: {}]  }
   0x1   :  { %10 = vsyncpa [#allocation3 + $0x1], 0 }
   0x2   :  { %11 = vsyncpa [#allocation6], 0 }
   0x3   :  { %12 = vsyncpa [#allocation4], 0 }
   0x4   :  { %14 = vsyncpa [#allocation4 + $0x1], 0  ;;  %s1121_s12 = smov 0   ;;  %s1123_s13 = smov 0  }
   0x5   :  { %s1125_s14 = smov 0   ;;  %s1127_s15 = smov 0  }
   0x6 LB: > { %s1142_s16 = sadd.s32 4294967295, %s1088_s15   ;;  %s730_s17 = sadd.s32 4294967294, %s1088_s15   ;;  %s1088_s15 = sphi %s1127_s15, %s1443_s15   ;;  %s1084_s14 = sphi %s1125_s14, %s1442_s14   ;;  %s1080_s13 = sphi %s1123_s13, %s1441_s13   ;;  %s1076_s12 = sphi %s1121_s12, %s1440_s12  }
   0x7   : > { %p40_p0 = scmp.ne.s32.totalorder %s1080_s13, %s1076_s12  ;;  %p41_p1 = scmp.eq.s32.totalorder %s1142_s16, 0 }
   0x8   : > { %p106_p2 = scmp.eq.s32.totalorder %s1142_s16, 1  ;;  %p112_p3 = scmp.eq.s32.totalorder %s730_s17, 1 }
   0x9   : > { %p1151_p4 = por %p41_p1, %p40_p0  ;;  %p731_p5 = scmp.ge.s32.totalorder %s1088_s15, 1 }
   0xa   : > { %p1156_p6 = por %p112_p3, %p40_p0  ;;  %p119_p7 = scmp.lt.s32.totalorder %s1088_s15, 3 }
   0xb   : > { %s130_s22 = sshll.u32 %s1429_s1, 4  ;;  %s1090_s24 = smov [#allocation5]   ;;  %s131_s22 = int_to_ptr.hbm [resolvable:$true] %s130_s22 }
   0xc   : > { %p1164_p8 = pnand %p731_p5, %p119_p7  ;;  %s132_s25 = sshll.u32 %s1090_s24, 4  ;;  %s133_s25 = int_to_ptr.vmem [resolvable:$true] %s132_s25 }
   0xd   : > { %s1174_s26 = sadd.s32 1, %s1088_s15   ;;  %s1091_s27 = smov 256  }
   0xe   : > { %p800_p9 = pneg %p1164_p8  ;;  %s1092_s28 = smov 16  }
   0xf   : > { %s24_s29 = ssub.s32 %s1088_s15, %s1174_s26  ;;  %s27_s30 = sadd.s32 1, %s1084_s14 }
  0x10   : > { %p801_p10 = pnand %p800_p9, %p41_p1  ;;  %p25_p12 = scmp.eq.s32.totalorder %s24_s29, 0 }
  0x11   : > { %p34_p13 = scmp.ne.s32.totalorder %s1084_s14, %s1080_s13  ;;  %p35_p0 = scmp.eq.s32.totalorder %s1088_s15, 0 }
  0x12   : > { %803 = dma.hbm_to_vmem [thread:$0]  (!%p801_p10), %s131_s22, 2048, %s133_s25, [#allocation6], %s1091_s27, %s1091_s27, %s1092_s28  }
  0x13   : > { %s1186_s4 = scalar_select %p25_p12, %s1084_s14, %s27_s30  }
  0x14   : > { %p1190_p3 = por %p106_p2, %p34_p13  ;;  %p813_p5 = scmp.lt.s32.totalorder %s1088_s15, 2 }
  0x15   : > { %s149_s6 = sand.u32 1, %s1084_s14   ;;  %s754_s7 = sshll.u32 %s1088_s15, 6 }
  0x16   : > { %p36_p7 = por %p35_p0, %p34_p13  ;;  %s734_s8 = sshll.u32 %s149_s6, 6 }
  0x17   : > { %s158_s11 = scalar_lea.hbm %s1428_s0, %s754_s7  ;;  %s153_s20 = scalar_lea.vmem [#allocation2], %s734_s8 }
  0x18   : > { %s159_s17 = sshll.u32 %s158_s11, 4  ;;  %s161_s21 = sshll.u32 %s153_s20, 4  ;;  %s160_s17 = int_to_ptr.hbm [resolvable:$true] %s159_s17  ;;  %s162_s21 = int_to_ptr.vmem [resolvable:$true] %s161_s21 }
  0x19   : > { %p1200_p9 = pnand %p813_p5, %p36_p7  ;;  %s150_s24 = scalar_lea.sflag [#allocation3], %s149_s6 }
  0x1a   : > { %s988_s25 = sshra.s32 %s160_s17, 4  ;;  %s995_s8 = scalar_lea.hbm %s1428_s0, 128  ;;  %s989_s25 = int_to_ptr.hbm [resolvable:$true] %s988_s25 }
  0x1b   : > { %s990_s29 = scalar_lea.hbm %s989_s25, 64  ;;  %p992_p10 = pneg %p1200_p9 }
  0x1c   : > { %p991_p2 = scmp.ne.s32.totalorder %s989_s25, %s990_s29  ;;  %p996_p0 = scmp.lt.s32.totalorder %s989_s25, %s1428_s0 }
  0x1d   : > { %p997_p5 = scmp.lt.s32.totalorder %s995_s8, %s990_s29 }
  0x1e   : > { %p993_p12 = pnand %p992_p10, %p991_p2 }
  0x1f   : > { %p998_p7 = por %p997_p5, %p996_p0 }
  0x20   : > { %p994_p13 = pneg %p993_p12 }
  0x22   : > { %p999_p11 = pnand %p998_p7, %p994_p13 }
  0x24   : > { %1002 = shalt.err (!%p999_p11)
}
  0x25   : > { %807 = dma.hbm_to_vmem [thread:$0]  (!%p1200_p9), %s160_s17, 1024, %s162_s21, %s150_s24, %s1091_s27, %s1091_s27, %s1092_s28  }
  0x26   : > { %173 = sbr.rel (%p1164_p8) target bundleno = 654 (0x28e), region = 32  ;;  %s1220_s6 = sand.u32 (!%p1164_p8), 1, %s1080_s13  }
  0x27   : > { %s738_s11 = sshll.u32 (!%p1164_p8), %s1220_s6, 6  ;;  %s176_s20 = scalar_lea.sflag (!%p1164_p8), [#allocation3], %s1220_s6 }
  0x28   : > { %s179_s25 = scalar_lea.vmem (!%p1164_p8), [#allocation2], %s738_s11 }
  0x2b   : > { %1063 = dma.done.wait (%p1151_p4), %s176_s20, 1024  }
  0x2c   : > { %1065 = vsyncadd (%p1151_p4), %s176_s20, 4294966272 }
  0x2d   : > { %1067 = dma.done.wait (%p41_p1), [#allocation6], 2048  }
  0x2e   : > { %1069 = vsyncadd (%p41_p1), [#allocation6], 4294965248  ;;  %v1232_v0 = vld [vmem:[%s179_s25 + $0x30] sm:$0xff]  ;;  %v1234_v1 = vld [vmem:[%s179_s25 + $0x38] sm:$0xff]  ;;  %s1093_s18 = smov 125   ;;  %s1094_s23 = smov 126  }
  0x2f   : > { %v1236_v2 = vld [vmem:[%s179_s25 + $0x10] sm:$0xff]  ;;  %v859_v3 = vpack.i.bf16 %v1234_v1, %v1232_v0  ;;  %v1240_v4 = vld [vmem:[%s179_s25 + $0x18] sm:$0xff]  ;;  %v1245_v6 = vld [vmem:[%s179_s25 + $0x20] sm:$0xff]  ;;  %s1095_s27 = smov 127   ;;  %s1096_s28 = smov 124   ;;  %vm290_vm0 = vcmask 1022976  }
  0x30   : > { %v869_v5 = vpack.i.bf16 %v1240_v4, %v1236_v2  ;;  %v1247_v7 = vld [vmem:[%s179_s25 + $0x28] sm:$0xff]  ;;  %v1249_v8 = vld [vmem:[%s179_s25] sm:$0xff]  ;;  %vm265_vm1 = vcmask 1031168   ;;  %v1097_v46 = vmov 0   ;;  %vm240_vm2 = vcmask 1039360   ;;  %v347_v63 = vld [vmem:[%s1430_s2 + $0x38] sm:$0xff] }
  0x31   : > { %860 = vrot.lane.b32.xlu0 %v859_v3, %s1093_s18  ;;  %880 = vrot.lane.b32.xlu2 %v859_v3, %s1094_s23  ;;  %v1251_v9 = vld [vmem:[%s179_s25 + $0x8] sm:$0xff]  ;;  %v864_v10 = vpack.i.bf16 %v1247_v7, %v1245_v6  ;;  %v344_v47 = vld [vmem:[%s1430_s2 + $0x20] sm:$0xff]  ;;  %vm315_vm3 = vcmask 1014784   ;;  %vm388_vm4 = vcmask 261120   ;;  %s1098_s17 = smov 2   ;;  %s740_s21 = sshll.u32 %s1220_s6, 5 }
  0x32   : > { %870 = vrot.lane.b32.xlu1 %v869_v5, %s1093_s18  ;;  %v874_v11 = vpack.i.bf16 %v1251_v9, %v1249_v8  ;;  %941 = vset.pattern.permute.xlu0 %v1097_v46  ;;  %s207_s22 = scalar_lea.vmem [#allocation7], %s740_s21  ;;  %s755_s24 = sshll.u32 %s1142_s16, 5 }
  0x33   : > { %939 = vset.pattern.permute.xlu1 %v1097_v46  ;;  %940 = vset.pattern.permute.xlu2 %v1097_v46  ;;  %s643_s30 = scalar_lea.hbm %s1431_s3, %s755_s24  ;;  %s644_s7 = sshll.u32 %s207_s22, 4  ;;  %s645_s7 = int_to_ptr.vmem [resolvable:$true] %s644_s7 }
  0x34   : > { %s646_s8 = sshll.u32 %s643_s30, 4  ;;  %s632_s16 = scalar_lea.sflag [#allocation4], %s1220_s6  ;;  %s647_s8 = int_to_ptr.hbm [resolvable:$true] %s646_s8 }
  0x35   : > { %s1032_s9 = sshra.s32 %s647_s8, 4  ;;  %s1038_s25 = scalar_lea.hbm %s1431_s3, 64  ;;  %s1033_s9 = int_to_ptr.hbm [resolvable:$true] %s1032_s9 }
  0x36   : > { %s1034_s10 = scalar_lea.hbm %s1033_s9, 32  ;;  %p1039_p11 = scmp.lt.s32.totalorder %s1033_s9, %s1431_s3 }
  0x37   : > { %p1035_p1 = scmp.ne.s32.totalorder %s1033_s9, %s1034_s10  ;;  %p1040_p9 = scmp.lt.s32.totalorder %s1038_s25, %s1034_s10 }
  0x39   : > { %865 = vrot.lane.b32.xlu0 %v864_v10, %s1093_s18  ;;  %885 = vrot.lane.b32.xlu2 %v864_v10, %s1094_s23  ;;  %p1036_p4 = pnand %p1035_p1, %p1190_p3  ;;  %p1041_p2 = por %p1040_p9, %p1039_p11 }
  0x3a   : > { %875 = vrot.lane.b32.xlu1 %v874_v11, %s1093_s18 }
  0x3b   : > { %p1037_p8 = pneg %p1036_p4 }
  0x3d   : > { %p1042_p10 = pnand %p1041_p2, %p1037_p8 }
  0x41   : > { %890 = vrot.lane.b32.xlu0 %v869_v5, %s1094_s23  ;;  %900 = vrot.lane.b32.xlu2 %v859_v3, %s1095_s27 }
  0x42   : > { %895 = vrot.lane.b32.xlu1 %v874_v11, %s1094_s23 }
  0x49   : > { %905 = vrot.lane.b32.xlu0 %v859_v3, %s1096_s28  ;;  %915 = vrot.lane.b32.xlu2 %v864_v10, %s1096_s28  ;;  %v346_v3 = vld [vmem:[%s1430_s2 + $0x30] sm:$0xff] }
  0x4a   : > { %910 = vrot.lane.b32.xlu1 %v864_v10, %s1095_s27 }
  0x51   : > { %920 = vrot.lane.b32.xlu0 %v869_v5, %s1095_s27  ;;  %930 = vrot.lane.b32.xlu2 %v874_v11, %s1095_s27 }
  0x52   : > { %925 = vrot.lane.b32.xlu1 %v869_v5, %s1096_s28 }
  0x59   : > { %935 = vrot.lane.b32.xlu0 %v874_v11, %s1096_s28 }
  0x5a   : > { %370 = vperm.xlu1 %939, %v344_v47  }
  0x61   : > { %380 = vperm.xlu0 %941, %v346_v3  }
  0x62   : > { %385 = vperm.xlu1 %939, %v347_v63  }
  0x8b   : > { %v881_v12 = vpop.permute.xlu2 %880 }
  0x8c   : > { %v883_v29 = vunpack.i.h.bf16 %v881_v12  ;;  %v882_v30 = vunpack.i.l.bf16 %v881_v12 }
  0x8e   : > { %v269_v38 = vsel %vm265_vm1, %v882_v30, %v883_v29  ;;  %v330_v29 = vld [vmem:[#allocation5 + $0x30] sm:$0xff] }
  0x8f   : > { %v338_v30 = vld [vmem:[#allocation5 + $0x70] sm:$0xff] }
  0x93   : > { %v886_v13 = vpop.permute.xlu2 %885 }
  0x94   : > { %v888_v31 = vunpack.i.h.bf16 %v886_v13  ;;  %v887_v32 = vunpack.i.l.bf16 %v886_v13 }
  0x96   : > { %v268_v39 = vsel %vm265_vm1, %v887_v32, %v888_v31  ;;  %v340_v31 = vld [vmem:[%s1430_s2] sm:$0xff]  ;;  %v327_v32 = vld [vmem:[#allocation5 + $0x18] sm:$0xff] }
  0x9b   : > { %v901_v20 = vpop.permute.xlu2 %900 }
  0x9c   : > { %v903_v44 = vunpack.i.h.bf16 %v901_v20  ;;  %v902_v45 = vunpack.i.l.bf16 %v901_v20  ;;  %v341_v20 = vld [vmem:[%s1430_s2 + $0x8] sm:$0xff] }
  0x9d   : > { %355 = vperm.xlu1 %939, %v341_v20  }
  0x9e   : > { %v244_v52 = vsel %vm240_vm2, %v902_v45, %v903_v44  ;;  %v335_v44 = vld [vmem:[#allocation5 + $0x58] sm:$0xff] }
  0xa3   : > { %v861_v14 = vpop.permute.xlu0 %860  ;;  %v916_v43 = vpop.permute.xlu2 %915 }
  0xa4   : > { %v863_v15 = vunpack.i.h.bf16 %v861_v14  ;;  %v862_v16 = vunpack.i.l.bf16 %v861_v14  ;;  %v871_v17 = vpop.permute.xlu1 %870  ;;  %v918_v50 = vunpack.i.h.bf16 %v916_v43  ;;  %v917_v51 = vunpack.i.l.bf16 %v916_v43  ;;  %v333_v43 = vld [vmem:[#allocation5 + $0x48] sm:$0xff] }
  0xa5   : > { %v873_v21 = vunpack.i.h.bf16 %v871_v17  ;;  %v872_v22 = vunpack.i.l.bf16 %v871_v17 }
  0xa6   : > { %v294_v18 = vsel %vm290_vm0, %v862_v16, %v863_v15  ;;  %v1276_v60 = vsel %vm315_vm3, %v917_v51, %v918_v50 }
  0xa7   : > { %413 = vmatpush.msra.mxu0 %v294_v18  ;;  %756 = vmatpush.msra.mxu2 %v294_v18  ;;  %v292_v33 = vsel %vm290_vm0, %v872_v22, %v873_v21  ;;  %v343_v21 = vld [vmem:[%s1430_s2 + $0x18] sm:$0xff] }
  0xa8   : > { %757 = vmatpush.msra.mxu3 %v294_v18  ;;  %365 = vperm.xlu0 %941, %v343_v21  }
  0xab   : > { %v866_v19 = vpop.permute.xlu0 %865  ;;  %v931_v61 = vpop.permute.xlu2 %930 }
  0xac   : > { %v868_v23 = vunpack.i.h.bf16 %v866_v19  ;;  %v867_v24 = vunpack.i.l.bf16 %v866_v19  ;;  %v876_v25 = vpop.permute.xlu1 %875  ;;  %v933_v5 = vunpack.i.h.bf16 %v931_v61  ;;  %v932_v10 = vunpack.i.l.bf16 %v931_v61 }
  0xad   : > { %v878_v26 = vunpack.i.h.bf16 %v876_v25  ;;  %v877_v27 = vunpack.i.l.bf16 %v876_v25  ;;  %v345_v25 = vld [vmem:[%s1430_s2 + $0x28] sm:$0xff] }
  0xae   : > { %v293_v28 = vsel %vm290_vm0, %v867_v24, %v868_v23  ;;  %v241_v18 = vsel %vm240_vm2, %v932_v10, %v933_v5  ;;  %375 = vperm.xlu2 %940, %v345_v25  }
  0xaf   : > { %414 = vmatpush.msra.mxu0 %v293_v28  ;;  %758 = vmatpush.msra.mxu2 %v293_v28  ;;  %v291_v34 = vsel %vm290_vm0, %v877_v27, %v878_v26  ;;  %v325_v27 = vld [vmem:[#allocation5 + $0x8] sm:$0xff] }
  0xb0   : > { %759 = vmatpush.msra.mxu3 %v293_v28  ;;  %v324_v28 = vld [vmem:[#allocation5] sm:$0xff] }
  0xb1   : > { %415 = vmatpush.msra.mxu0 %v292_v33  ;;  %760 = vmatpush.msra.mxu2 %v292_v33 }
  0xb2   : > { %761 = vmatpush.msra.mxu3 %v292_v33  ;;  %v326_v33 = vld [vmem:[#allocation5 + $0x10] sm:$0xff] }
  0xb3   : > { %v891_v35 = vpop.permute.xlu0 %890  ;;  %416 = vmatpush.msra.mxu0 %v291_v34  ;;  %762 = vmatpush.msra.mxu2 %v291_v34 }
  0xb4   : > { %v893_v36 = vunpack.i.h.bf16 %v891_v35  ;;  %v892_v37 = vunpack.i.l.bf16 %v891_v35  ;;  %763 = vmatpush.msra.mxu3 %v291_v34  ;;  %v896_v40 = vpop.permute.xlu1 %895  ;;  %v332_v34 = vld [vmem:[#allocation5 + $0x40] sm:$0xff]  ;;  %v337_v35 = vld [vmem:[#allocation5 + $0x68] sm:$0xff] }
  0xb5   : > { %417 = vmatpush.msra.mxu0 %v269_v38  ;;  %764 = vmatpush.msra.mxu2 %v269_v38  ;;  %v898_v41 = vunpack.i.h.bf16 %v896_v40  ;;  %v897_v42 = vunpack.i.l.bf16 %v896_v40  ;;  %v339_v40 = vld [vmem:[#allocation5 + $0x78] sm:$0xff] }
  0xb6   : > { %765 = vmatpush.msra.mxu3 %v269_v38  ;;  %v267_v48 = vsel %vm265_vm1, %v892_v37, %v893_v36  ;;  %350 = vperm.xlu2 %940, %v340_v31   ;;  %v342_v36 = vld [vmem:[%s1430_s2 + $0x10] sm:$0xff]  ;;  %v329_v37 = vld [vmem:[#allocation5 + $0x28] sm:$0xff]  ;;  %v328_v38 = vld [vmem:[#allocation5 + $0x20] sm:$0xff] }
  0xb7   : > { %418 = vmatpush.msra.mxu0 %v268_v39  ;;  %766 = vmatpush.msra.mxu2 %v268_v39  ;;  %v266_v49 = vsel %vm265_vm1, %v897_v42, %v898_v41  ;;  %v331_v41 = vld [vmem:[#allocation5 + $0x38] sm:$0xff]  ;;  %v336_v42 = vld [vmem:[#allocation5 + $0x60] sm:$0xff] }
  0xb8   : > { %767 = vmatpush.msra.mxu3 %v268_v39  ;;  %v334_v39 = vld [vmem:[#allocation5 + $0x50] sm:$0xff] }
  0xb9   : > { %419 = vmatpush.msra.mxu0 %v267_v48  ;;  %768 = vmatpush.msra.mxu2 %v267_v48 }
  0xba   : > { %769 = vmatpush.msra.mxu3 %v267_v48 }
  0xbb   : > { %v906_v53 = vpop.permute.xlu0 %905  ;;  %420 = vmatpush.msra.mxu0 %v266_v49  ;;  %770 = vmatpush.msra.mxu2 %v266_v49 }
  0xbc   : > { %v908_v54 = vunpack.i.h.bf16 %v906_v53  ;;  %v907_v55 = vunpack.i.l.bf16 %v906_v53  ;;  %771 = vmatpush.msra.mxu3 %v266_v49  ;;  %v911_v56 = vpop.permute.xlu1 %910 }
  0xbd   : > { %421 = vmatpush.msra.mxu0 %v244_v52  ;;  %772 = vmatpush.msra.mxu2 %v244_v52  ;;  %v913_v57 = vunpack.i.h.bf16 %v911_v56  ;;  %v912_v58 = vunpack.i.l.bf16 %v911_v56 }
  0xbe   : > { %773 = vmatpush.msra.mxu3 %v244_v52  ;;  %v1273_v59 = vsel %vm315_vm3, %v907_v55, %v908_v54  ;;  %360 = vperm.xlu2 %940, %v342_v36  }
  0xbf   : > { %466 = vmatpush.msra.mxu1 %v1273_v59  ;;  %v243_v62 = vsel %vm240_vm2, %v912_v58, %v913_v57 }
  0xc0   : > { %422 = vmatpush.msra.mxu0 %v243_v62  ;;  %774 = vmatpush.msra.mxu2 %v243_v62 }
  0xc1   : > { %775 = vmatpush.msra.mxu3 %v243_v62  ;;  %467 = vmatpush.msra.mxu1 %v1276_v60 }
  0xc3   : > { %v921_v11 = vpop.permute.xlu0 %920 }
  0xc4   : > { %v923_v12 = vunpack.i.h.bf16 %v921_v11  ;;  %v922_v13 = vunpack.i.l.bf16 %v921_v11  ;;  %v926_v14 = vpop.permute.xlu1 %925 }
  0xc5   : > { %v928_v15 = vunpack.i.h.bf16 %v926_v14  ;;  %v927_v16 = vunpack.i.l.bf16 %v926_v14 }
  0xc6   : > { %v242_v17 = vsel %vm240_vm2, %v922_v13, %v923_v12 }
  0xc7   : > { %423 = vmatpush.msra.mxu0 %v242_v17  ;;  %776 = vmatpush.msra.mxu2 %v242_v17  ;;  %v317_v19 = vsel %vm315_vm3, %v927_v16, %v928_v15 }
  0xc8   : > { %777 = vmatpush.msra.mxu3 %v242_v17  ;;  %468 = vmatpush.msra.mxu1 %v317_v19 }
  0xc9   : > { %424 = vmatpush.msra.mxu0 %v241_v18  ;;  %778 = vmatpush.msra.mxu2 %v241_v18 }
  0xca   : > { %779 = vmatpush.msra.mxu3 %v241_v18 }
  0xcb   : > { %v936_v22 = vpop.permute.xlu0 %935  ;;  %425 = vmatpush.msra.mxu0 %v1232_v0  ;;  %780 = vmatpush.msra.mxu2 %v1232_v0 }
  0xcc   : > { %v938_v23 = vunpack.i.h.bf16 %v936_v22  ;;  %v937_v24 = vunpack.i.l.bf16 %v936_v22  ;;  %781 = vmatpush.msra.mxu3 %v1232_v0  ;;  %v371_v49 = vpop.permute.xlu1 %370 }
  0xcd   : > { %426 = vmatpush.msra.mxu0 %v1245_v6  ;;  %782 = vmatpush.msra.mxu2 %v1245_v6 }
  0xce   : > { %783 = vmatpush.msra.mxu3 %v1245_v6  ;;  %v316_v26 = vsel %vm315_vm3, %v937_v24, %v938_v23 }
  0xcf   : > { %427 = vmatpush.msra.mxu0 %v1236_v2  ;;  %784 = vmatpush.msra.mxu2 %v1236_v2 }
  0xd0   : > { %785 = vmatpush.msra.mxu3 %v1236_v2  ;;  %469 = vmatpush.msra.mxu1 %v316_v26 }
  0xd1   : > { %741 = vmatmul.msk.f32.vlgmr.msra.gmra.mxu1 %vm388_vm4, %v325_v27  ;;  %428 = vmatpush.msra.mxu0 %v1249_v8 }
  0xd2   : > { %786 = vmatpush.msra.mxu2 %v1249_v8  ;;  %787 = vmatpush.msra.mxu3 %v1249_v8 }
  0xd3   : > { %429 = vmatmul.f32.vlgmr.msra.gmra.mxu0 %v324_v28  ;;  %438 = vmatmul.f32.vlgmr.msra.gmra.mxu2 %v330_v29  ;;  %v381_v63 = vpop.permute.xlu0 %380 }
  0xd4   : > { %450 = vmatmul.f32.vlgmr.msra.gmra.mxu3 %v338_v30  ;;  %v386_v53 = vpop.permute.xlu1 %385 }
  0xd5   : > { %788 = vmatpush.msrb.mxu3 %v1273_v59 }
  0xd7   : > { %789 = vmatpush.msrb.mxu3 %v1276_v60 }
  0xd9   : > { %790 = vmatpush.msrb.mxu3 %v317_v19  ;;  %742 = vmatmul.msk.f32.gmra.mxu1 %vm388_vm4, %v327_v32 }
  0xdb   : > { %791 = vmatpush.msrb.mxu3 %v316_v26  ;;  %432 = vmatmul.f32.gmra.mxu0 %v326_v33 }
  0xdc   : > { %441 = vmatmul.f32.gmra.mxu2 %v332_v34  ;;  %747 = vmatmul.msk.f32.vlgmr.msrb.gmra.mxu3 %vm388_vm4, %v337_v35 }
  0xe1   : > { %743 = vmatmul.msk.f32.gmra.mxu1 %vm388_vm4, %v329_v37 }
  0xe3   : > { %435 = vmatmul.f32.gmra.mxu0 %v328_v38 }
  0xe4   : > { %444 = vmatmul.f32.gmra.mxu2 %v334_v39  ;;  %748 = vmatmul.msk.f32.gmra.mxu3 %vm388_vm4, %v339_v40 }
  0xe9   : > { %744 = vmatmul.msk.f32.gmra.mxu1 %vm388_vm4, %v331_v41 }
  0xec   : > { %447 = vmatmul.f32.gmra.mxu2 %v336_v42 }
  0xf1   : > { %745 = vmatmul.msk.f32.gmra.mxu1 %vm388_vm4, %v333_v43 }
  0xf9   : > { %746 = vmatmul.msk.f32.gmra.mxu1 %vm388_vm4, %v335_v44 }
 0x108   : > { %v376_v16 = vpop.permute.xlu2 %375 }
 0x10f   : > { %v356_v37 = vpop.permute.xlu1 %355 }
 0x110   : > { %v351_v30 = vpop.permute.xlu2 %350 }
 0x118   : > { %v361_v41 = vpop.permute.xlu2 %360 }
 0x14e   : > { %v1328_v45 = vpop.f32.mrf.mxu1 }
 0x150   : > { %v430_v13 = vpop.f32.mrf.mxu0 }
 0x151   : > { %v431_v35 = vadd.f32 %v430_v13, %v351_v30 }
 0x156   : > { %v1330_v46 = vpop.f32.mrf.mxu2  ;;  %v1332_v47 = vpop.f32.mrf.mxu1 }
 0x157   : > { %v451_v48 = vpop.f32.mrf.mxu3 }
 0x158   : > { %v452_v54 = vadd.f32 %v451_v48, %v386_v53  ;;  %v433_v28 = vpop.f32.mrf.mxu0  ;;  %v472_v48 = vadd.f32 %v1328_v45, %v431_v35 }
 0x15e   : > { %v1334_v50 = vpop.f32.mrf.mxu1 }
 0x15f   : > { %v442_v51 = vpop.f32.mrf.mxu2  ;;  %v489_v52 = vpop.f32.mrf.mxu3 }
 0x160   : > { %v443_v61 = vadd.f32 %v442_v51, %v371_v49  ;;  %v436_v42 = vpop.f32.mrf.mxu0  ;;  %v434_v49 = vadd.f32 %v433_v28, %v356_v37 }
 0x166   : > { %v1336_v55 = vpop.f32.mrf.mxu1 }
 0x167   : > { %v445_v56 = vpop.f32.mrf.mxu2  ;;  %v492_v57 = vpop.f32.mrf.mxu3 }
 0x168   : > { %v493_v58 = vadd.f32 %v492_v57, %v452_v54  ;;  %v446_v18 = vadd.f32 %v445_v56, %v376_v16  ;;  %v437_v56 = vadd.f32 %v436_v42, %v361_v41 }
 0x16a   : > { %v498_v59 = vsub.f32 0.0, %v493_v58 }
 0x16c   : > { %v505_v60 = vmul.f32 1.442695, %v498_v59 }
 0x16e   : > { %942 = vpow2.f32 %v505_v60  ;;  %v483_v62 = vpop.f32.mrf.mxu1 }
 0x16f   : > { %v448_v3 = vpop.f32.mrf.mxu2  ;;  %v484_v5 = vadd.f32 %v483_v62, %v443_v61 }
 0x170   : > { %v449_v10 = vadd.f32 %v448_v3, %v381_v63 }
 0x171   : > { %v495_v11 = vsub.f32 0.0, %v484_v5 }
 0x172   : > { %v490_v12 = vadd.f32 %v489_v52, %v449_v10  ;;  %v478_v10 = vadd.f32 %v1334_v50, %v437_v56 }
 0x173   : > { %v499_v14 = vmul.f32 1.442695, %v495_v11 }
 0x174   : > { %v943_v15 = vpop.eup %942  ;;  %v497_v17 = vsub.f32 0.0, %v490_v12 }
 0x175   : > { %v1338_v19 = vadd.f32 1.0, %v943_v15  ;;  %944 = vpow2.f32 %v499_v14 }
 0x176   : > { %v503_v20 = vmul.f32 1.442695, %v497_v17  ;;  %v486_v21 = vpop.f32.mrf.mxu1 }
 0x177   : > { %946 = vrcp.f32 %v1338_v19  ;;  %v487_v22 = vadd.f32 %v486_v21, %v446_v18  ;;  %vm558_vm7 = vweird.f32 %v1338_v19  ;;  %v564_v13 = vand.u32 2147483648, %v1338_v19  ;;  %v366_v18 = vpop.permute.xlu0 %365 }
 0x178   : > { %948 = vpow2.f32 %v503_v20  ;;  %v562_v17 = vand.u32 2147483647, %v1338_v19 }
 0x179   : > { %v496_v23 = vsub.f32 0.0, %v487_v22  ;;  %v565_v28 = vor.u32 1.1754944e-38, %v564_v13 }
 0x17a   : > { %vm563_vm3 = vcmp.eq.f32.partialorder %v562_v17, 8.507059e+37 }
 0x17b   : > { %v945_v24 = vpop.eup %944  ;;  %v501_v25 = vmul.f32 1.442695, %v496_v23 }
 0x17c   : > { %v507_v26 = vadd.f32 1.0, %v945_v24 }
 0x17d   : > { %v1341_v27 = vpop.eup %946  ;;  %950 = vpow2.f32 %v501_v25 }
 0x17e   : > { %v949_v29 = vpop.eup %948  ;;  %952 = vrcp.f32 %v507_v26  ;;  %v554_v32 = vmul.f32 %v1341_v27, %v1338_v19  ;;  %v522_v44 = vand.u32 2147483648, %v507_v26  ;;  %v520_v53 = vand.u32 2147483647, %v507_v26 }
 0x17f   : > { %v509_v31 = vadd.f32 1.0, %v949_v29  ;;  %vm516_vm6 = vweird.f32 %v507_v26  ;;  %vm559_vm8 = vweird.f32 %v1341_v27  ;;  %v440_v29 = vadd.f32 %v1330_v46, %v366_v18 }
 0x180   : > { %v555_v39 = vsub.f32 1.0, %v554_v32  ;;  %v523_v59 = vor.u32 1.1754944e-38, %v522_v44  ;;  %vm521_vm12 = vcmp.eq.f32.partialorder %v520_v53, 8.507059e+37  ;;  %vm1363_vm15 = vmor %vm558_vm7, %vm559_vm8  ;;  %v475_v32 = vadd.f32 %v1332_v47, %v434_v49 }
 0x181   : > { %954 = vrcp.f32 %v509_v31  ;;  %v550_v60 = vand.u32 2147483648, %v509_v31  ;;  %vm544_vm10 = vweird.f32 %v509_v31  ;;  %v548_v62 = vand.u32 2147483647, %v509_v31 }
 0x182   : > { %v556_v54 = vmul.f32 %v1341_v27, %v555_v39 }
 0x183   : > { %v951_v33 = vpop.eup %950  ;;  %v551_v15 = vor.u32 1.1754944e-38, %v550_v60  ;;  %vm549_vm14 = vcmp.eq.f32.partialorder %v548_v62, 8.507059e+37 }
 0x184   : > { %v953_v34 = vpop.eup %952  ;;  %v1345_v36 = vadd.f32 1.0, %v951_v33  ;;  %v557_v5 = vadd.f32 %v1341_v27, %v556_v54  ;;  %v481_v33 = vadd.f32 %v1336_v55, %v440_v29 }
 0x185   : > { %v512_v38 = vmul.f32 %v953_v34, %v507_v26  ;;  %vm517_vm5 = vweird.f32 %v953_v34 }
 0x186   : > { %956 = vrcp.f32 %v1345_v36  ;;  %vm518_vm9 = vmor %vm516_vm6, %vm517_vm5  ;;  %v534_v21 = vand.u32 2147483647, %v1345_v36  ;;  %v536_v22 = vand.u32 2147483648, %v1345_v36  ;;  %v561_v25 = vsel %vm1363_vm15, %v1341_v27, %v557_v5 }
 0x187   : > { %v955_v40 = vpop.eup %954  ;;  %v513_v43 = vsub.f32 1.0, %v512_v38  ;;  %vm530_vm2 = vweird.f32 %v1345_v36 }
 0x188   : > { %v540_v51 = vmul.f32 %v955_v40, %v509_v31  ;;  %vm545_vm11 = vweird.f32 %v955_v40  ;;  %v537_v19 = vor.u32 1.1754944e-38, %v536_v22  ;;  %v566_v31 = vsel %vm563_vm3, %v565_v28, %v561_v25 }
 0x189   : > { %v514_v52 = vmul.f32 %v953_v34, %v513_v43  ;;  %vm546_vm13 = vmor %vm544_vm10, %vm545_vm11  ;;  %vm535_vm5 = vcmp.eq.f32.partialorder %v534_v21, 8.507059e+37  ;;  %v570_v37 = vmul.f32 %v566_v31, %v481_v33 }
 0x18a   : > { %v541_v57 = vsub.f32 1.0, %v540_v51 }
 0x18b   : > { %v515_v58 = vadd.f32 %v953_v34, %v514_v52 }
 0x18c   : > { %v957_v61 = vpop.eup %956  ;;  %v542_v45 = vmul.f32 %v955_v40, %v541_v57 }
 0x18d   : > { %v519_v63 = vsel %vm518_vm9, %v953_v34, %v515_v58  ;;  %v526_v3 = vmul.f32 %v957_v61, %v1345_v36  ;;  %vm531_vm0 = vweird.f32 %v957_v61 }
 0x18e   : > { %v524_v11 = vsel %vm521_vm12, %v523_v59, %v519_v63  ;;  %v543_v12 = vadd.f32 %v955_v40, %v542_v45  ;;  %vm532_vm4 = vmor %vm530_vm2, %vm531_vm0 }
 0x18f   : > { %v567_v14 = vmul.f32 %v524_v11, %v472_v48  ;;  %v527_v16 = vsub.f32 1.0, %v526_v3 }
 0x190   : > { %v547_v20 = vsel %vm546_vm13, %v955_v40, %v543_v12 }
 0x191   : > { %575 = vrot.lane.b32.xlu1 %v567_v14, %s1098_s17  ;;  %v552_v23 = vsel %vm549_vm14, %v551_v15, %v547_v20  ;;  %v528_v24 = vmul.f32 %v957_v61, %v527_v16 }
 0x192   : > { %v569_v26 = vmul.f32 %v552_v23, %v478_v10 }
 0x193   : > { %v529_v30 = vadd.f32 %v957_v61, %v528_v24 }
 0x194   : > { %579 = vrot.lane.b32.xlu0 %v569_v26, %s1098_s17 }
 0x195   : > { %v533_v34 = vsel %vm532_vm4, %v957_v61, %v529_v30 }
 0x196   : > { %v538_v35 = vsel %vm535_vm5, %v537_v19, %v533_v34 }
 0x197   : > { %v568_v27 = vmul.f32 %v538_v35, %v475_v32 }
 0x199   : > { %577 = vrot.lane.b32.xlu2 %v568_v27, %s1098_s17  ;;  %581 = vrot.lane.b32.xlu1 %v570_v37, %s1098_s17 }
 0x1f3   : > { %v578_v46 = vpop.permute.xlu2 %577 }
 0x1f4   : > { %v589_v38 = vadd.f32 %v578_v46, %v1236_v2  ;;  %v590_v41 = vadd.f32 %v578_v46, %v1240_v4 }
 0x1f6   : > { %607 = vrot.lane.b32.xlu1 %v589_v38, %s1094_s23 }
 0x203   : > { %v576_v36 = vpop.permute.xlu1 %575 }
 0x204   : > { %v587_v39 = vadd.f32 %v576_v36, %v1249_v8  ;;  %v588_v40 = vadd.f32 %v576_v36, %v1251_v9 }
 0x206   : > { %v580_v47 = vpop.permute.xlu0 %579  ;;  %605 = vrot.lane.b32.xlu0 %v588_v40, %s1094_s23  ;;  %603 = vrot.lane.b32.xlu2 %v587_v39, %s1094_s23 }
 0x207   : > { %v592_v55 = vadd.f32 %v580_v47, %v1247_v7  ;;  %v591_v2 = vadd.f32 %v580_v47, %v1245_v6 }
 0x209   : > { %613 = vrot.lane.b32.xlu1 %v592_v55, %s1094_s23 }
 0x20b   : > { %v582_v8 = vpop.permute.xlu1 %581 }
 0x20c   : > { %v593_v9 = vadd.f32 %v582_v8, %v1232_v0  ;;  %v594_v42 = vadd.f32 %v582_v8, %v1234_v1 }
 0x20e   : > { %611 = vrot.lane.b32.xlu0 %v591_v2, %s1094_s23  ;;  %609 = vrot.lane.b32.xlu2 %v590_v41, %s1094_s23 }
 0x216   : > { %617 = vrot.lane.b32.xlu0 %v594_v42, %s1094_s23  ;;  %615 = vrot.lane.b32.xlu2 %v593_v9, %s1094_s23 }
 0x260   : > { %v604_v7 = vpop.permute.xlu2 %603 }
 0x268   : > { %v610_v43 = vpop.permute.xlu2 %609  ;;  %v608_v4 = vpop.permute.xlu1 %607 }
 0x269   : > { %v620_v6 = vsel %vm265_vm1, %v608_v4, %v610_v43 }
 0x26a   : > { %628 = vst [vmem:[%s207_s22 + $0x8] sm:$0xff] %v620_v6 }
 0x270   : > { %v616_v51 = vpop.permute.xlu2 %615 }
 0x278   : > { %v606_v44 = vpop.permute.xlu0 %605 }
 0x279   : > { %v619_v48 = vsel %vm265_vm1, %v604_v7, %v606_v44 }
 0x27a   : > { %627 = vst [vmem:[%s207_s22] sm:$0xff] %v619_v48 }
 0x27b   : > { %v614_v0 = vpop.permute.xlu1 %613 }
 0x280   : > { %v612_v1 = vpop.permute.xlu0 %611 }
 0x281   : > { %v621_v49 = vsel %vm265_vm1, %v612_v1, %v614_v0 }
 0x282   : > { %629 = vst [vmem:[%s207_s22 + $0x10] sm:$0xff] %v621_v49 }
 0x288   : > { %v618_v52 = vpop.permute.xlu0 %617 }
 0x289   : > { %v622_v53 = vsel %vm265_vm1, %v616_v51, %v618_v52 }
 0x28a   : > { %630 = vst [vmem:[%s207_s22 + $0x18] sm:$0xff] %v622_v53 }
 0x28b   : > { %1045 = shalt.err (!%p1042_p10)
}
 0x28c   : > { %s1099_s6 = smov 128   ;;  %s1100_s28 = smov 8  }
 0x28d   : > { %798 = dma.vmem_to_hbm [thread:$0]  (%p1190_p3), %s645_s7, 512, %s647_s8, %s632_s16, %s1099_s6, %s1099_s6, %s1100_s28  }
 0x28e PF: > { %s661_s17 = sand.u32 1, %s1076_s12   ;;  %p1439_p12 = scmp.ge.s32.totalorder %s1088_s15, 2 }
 0x28f   : > { %s662_s21 = scalar_lea.sflag [#allocation4], %s661_s17 }
 0x290   : > { %p809_p13 = pnand %p1439_p12, %p1156_p6 }
 0x292   : > { %p810_p0 = pneg %p809_p13 }
 0x294   : > { %1071 = dma.done.wait (%p810_p0), %s662_s21, 512  }
 0x295   : > { %1073 = vsyncadd (%p810_p0), %s662_s21, 4294966784  ;;  %p17_p5 = scmp.ge.s32.totalorder %s1174_s26, 4   ;;  %s1440_s12 = smov %s1080_s13 }
 0x296   : > { %s1441_s13 = smov %s1084_s14  ;;  %s1442_s14 = smov %s1186_s4 }
 0x297   : > { %s1443_s15 = smov %s1174_s26  ;;  %19 = sbr.rel (!%p17_p5) target bundleno = 6 (0x6), region = 81 }
 0x29c   :  { %668 = vsyncpa [#allocation3], 1 }
 0x29d   :  { %670 = vsyncpa [#allocation3 + $0x1], 1 }
 0x29e   :  { %671 = vsyncpa [#allocation6], 1 }
 0x29f   :  { %672 = vsyncpa [#allocation4], 1 }
 0x2a0   :  { %674 = vsyncpa [#allocation4 + $0x1], 1 }

</bundles_post_ra>
